<compile_context>
chip_gen: v6e
topology: v6e:2x2x1
jax: 0.10.0
libtpu: 0.0.40
codegen_flags: <defaults>
</compile_context>

<pallas_src>
import functools

import jax
import jax.numpy as jnp
import numpy as np
from jax.experimental import pallas as pl
from jax.experimental.pallas import tpu as pltpu


def _round_up(n: int, m: int) -> int:
    return (n + m - 1) // m * m


def _bf16_elementwise_default() -> bool:
    """bf16 gate elementwise math on v6e/v7x; f32 on v5e and older (no bf16 VPU/EUP)."""
    try:
        kind = jax.devices()[0].device_kind.lower()
    except Exception:
        return False
    return not any(t in kind for t in ("v2", "v3", "v4", "v5"))


def _lstm_fc_kernel(x_ref, w_ref, b_ref, wfc_ref, bfc_ref, out_ref, *, fp, hp, bf16_ew):
    """Fused: LSTM layer0 cell -> LSTM layer1 cell -> Linear (one batch block).

    w_ref rows: [0:fp]      layer0 W_ih^T (f-gate dropped, gate order i,g,o), bf16
                [fp:fp+hp]  layer1 W_ih^T, bf16
    b_ref rows: 0 -> layer0 (b_ih+b_hh), 1 -> layer1 (f32).
    wfc_ref: [hp, op] bf16, bfc_ref: [1, op] f32.
    """

    def sigmoid(g):
        # One EUP push (tanh) + two cheap VPU ops, vs exp + reciprocal.
        return 0.5 * jnp.tanh(0.5 * g) + 0.5

    def cell(inp_bf16, w, b):
        # h_prev == 0, c_prev == 0 (seq_len == 1) -> W_hh and f-gate contribute 0.
        gates = jnp.dot(inp_bf16, w, preferred_element_type=jnp.float32) + b
        if bf16_ew:
            gates = gates.astype(jnp.bfloat16)
        i_g = sigmoid(gates[:, 0 * hp:1 * hp])          # lane-aligned slices
        g_g = jnp.tanh(gates[:, 1 * hp:2 * hp])
        o_g = sigmoid(gates[:, 2 * hp:3 * hp])
        h = o_g * jnp.tanh(i_g * g_g)                   # c = i*g (f*c_prev == 0)
        return h.astype(jnp.bfloat16)

    h1 = cell(x_ref[...], w_ref[0:fp, :], b_ref[0:1, :])            # [Bb, hp] bf16
    h2 = cell(h1, w_ref[fp:fp + hp, :], b_ref[1:2, :])               # [Bb, hp] bf16

    out_ref[...] = (jnp.dot(h2, wfc_ref[...], preferred_element_type=jnp.float32)
                    + bfc_ref[...])                                  # [Bb, op] f32


@functools.partial(jax.jit, static_argnames=("block_b", "bf16_elementwise"))
def lstm_forward_padded(x_pad, packed, *, block_b, bf16_elementwise=True):
    """Production path: x_pad is bf16 [bp, fp] with bp % block_b == 0.

    Returns the lane-dense padded slab [bp, op] (no wrapper-side slice copy).
    """
    w_stack, b_stack = packed["w_stack"], packed["b_stack"]
    w_fc, b_fc = packed["w_fc"], packed["b_fc"]
    rows, width = w_stack.shape
    hp = width // 3
    fp = rows - hp
    op = w_fc.shape[1]
    bp = x_pad.shape[0]
    assert bp % block_b == 0 and x_pad.shape[1] == fp

    kernel = functools.partial(_lstm_fc_kernel, fp=fp, hp=hp, bf16_ew=bf16_elementwise)
    return pl.pallas_call(
        kernel,
        out_shape=jax.ShapeDtypeStruct((bp, op), jnp.float32),
        grid=(bp // block_b,),
        in_specs=[
            pl.BlockSpec((block_b, fp), lambda i: (i, 0)),   # x tile
            pl.BlockSpec((rows, width), lambda i: (0, 0)),   # gate weights, resident
            pl.BlockSpec((2, width), lambda i: (0, 0)),      # gate biases, resident
            pl.BlockSpec((hp, op), lambda i: (0, 0)),        # fc weight, resident
            pl.BlockSpec((1, op), lambda i: (0, 0)),         # fc bias, resident
        ],
        out_specs=pl.BlockSpec((block_b, op), lambda i: (i, 0)),
        compiler_params=pltpu.CompilerParams(
            dimension_semantics=("parallel",)),
    )(x_pad, w_stack, b_stack, w_fc, b_fc)


def _choose_block_b(batch: int) -> int:
    # >= 2 grid blocks once B > 16 (so both v7x TensorCores get work); generous
    # cap since per-block VMEM at 1024 rows is only a few MiB on any chip.
    if batch <= 16:
        return 16
    return min(_round_up((batch + 1) // 2, 16), 1024)


@functools.partial(jax.jit, static_argnames=("out_features", "bf16_elementwise"))
def lstm_forward(x, packed, *, out_features, bf16_elementwise=True):
    """Convenience path: x [B, F] f32 -> [B, O] f32 (pads + slices inside jit).

    For large B, prefer lstm_forward_padded with pre-padded bf16 input and
    consume the padded slab to avoid the extra HBM passes.
    """
    rows, width = packed["w_stack"].shape
    hp = width // 3
    fp = rows - hp
    B, F = x.shape
    block_b = _choose_block_b(B)
    bp = _round_up(B, block_b)
    x_pad = jnp.pad(x.astype(jnp.bfloat16), ((0, bp - B), (0, fp - F)))
    out_pad = lstm_forward_padded(x_pad, packed, block_b=block_b,
                                  bf16_elementwise=bf16_elementwise)
    return out_pad[:B, :out_features]


def make_params(key, feature_size, hidden_size, output_size):
    """Raw PyTorch-layout parameters, uniform(-k, k) init (deterministic)."""
    ks = jax.random.split(key, 10)
    k = 1.0 / np.sqrt(hidden_size)

    def u(kk, shape):
        return jax.random.uniform(kk, shape, jnp.float32, -k, k)

    return {
        "w_ih0": u(ks[0], (4 * hidden_size, feature_size)),
        "w_hh0": u(ks[1], (4 * hidden_size, hidden_size)),
        "b_ih0": u(ks[2], (4 * hidden_size,)),
        "b_hh0": u(ks[3], (4 * hidden_size,)),
        "w_ih1": u(ks[4], (4 * hidden_size, hidden_size)),
        "w_hh1": u(ks[5], (4 * hidden_size, hidden_size)),
        "b_ih1": u(ks[6], (4 * hidden_size,)),
        "b_hh1": u(ks[7], (4 * hidden_size,)),
        "w_fc":  u(ks[8], (output_size, hidden_size)),
        "b_fc":  u(ks[9], (output_size,)),
    }


def pack_params(raw, feature_size, hidden_size, output_size):
    """Glue: drop f-gate columns, transpose, pad each gate to 128 lanes, cast
    weights to bf16 and stack the two gate matrices; fc weight kept separate.

    TODO(synk): W_hh / h0 / c0 are omitted — with seq_len == 1 and zero initial
    states their contribution is exactly zero.  Invalid if seq_len > 1.
    """
    F, H, O = feature_size, hidden_size, output_size
    fp = _round_up(F, 16)     # 16: bf16 sublane alignment for the w_stack row slice
    hp = _round_up(H, 128)
    op = _round_up(O, 128)

    keep = np.concatenate([np.arange(0, H),            # i
                           np.arange(2 * H, 3 * H),    # g
                           np.arange(3 * H, 4 * H)])   # o   (f dropped)

    def gate_pack(w_ih, b_ih, b_hh, in_dim, in_pad):
        w_t = jnp.asarray(w_ih)[keep].T.reshape(in_dim, 3, H)     # order i,g,o
        w_t = jnp.pad(w_t, ((0, in_pad - in_dim), (0, 0), (0, hp - H)))
        w_t = w_t.reshape(in_pad, 3 * hp)
        b = (jnp.asarray(b_ih) + jnp.asarray(b_hh))[keep].reshape(3, H)
        b = jnp.pad(b, ((0, 0), (0, hp - H))).reshape(3 * hp)
        return w_t, b

    w0, b0 = gate_pack(raw["w_ih0"], raw["b_ih0"], raw["b_hh0"], F, fp)
    w1, b1 = gate_pack(raw["w_ih1"], raw["b_ih1"], raw["b_hh1"], H, hp)

    wfc = jnp.pad(jnp.asarray(raw["w_fc"]).T, ((0, hp - H), (0, op - O)))   # [hp, op]
    bfc = jnp.pad(jnp.asarray(raw["b_fc"]), (0, op - O)).reshape(1, op)     # [1, op]

    return {
        "w_stack": jnp.concatenate([w0, w1], axis=0).astype(jnp.bfloat16),  # [fp+hp, 3hp]
        "b_stack": jnp.stack([b0, b1], axis=0),                             # [2, 3hp] f32
        "w_fc": wfc.astype(jnp.bfloat16),                                   # [hp, op] bf16
        "b_fc": bfc,                                                        # [1, op]  f32
    }


def reference_forward(x, raw, hidden_size):
    """Plain-JAX f32 reference of the full PyTorch math (incl. W_hh and f-gate)."""
    H = hidden_size
    B = x.shape[0]

    def cell(inp, h_prev, c_prev, w_ih, w_hh, b_ih, b_hh):
        g = inp @ w_ih.T + h_prev @ w_hh.T + b_ih + b_hh
        i = jax.nn.sigmoid(g[:, 0:H])
        f = jax.nn.sigmoid(g[:, H:2 * H])
        gg = jnp.tanh(g[:, 2 * H:3 * H])
        o = jax.nn.sigmoid(g[:, 3 * H:4 * H])
        c = f * c_prev + i * gg
        return o * jnp.tanh(c), c

    z = jnp.zeros((B, H), jnp.float32)
    h1, _ = cell(x, z, z, raw["w_ih0"], raw["w_hh0"], raw["b_ih0"], raw["b_hh0"])
    h2, _ = cell(h1, z, z, raw["w_ih1"], raw["w_hh1"], raw["b_ih1"], raw["b_hh1"])
    return h2 @ raw["w_fc"].T + raw["b_fc"]


if __name__ == "__main__":
    batch = 4
    feature_size = 16
    hidden_size = 128        # module default
    output_size = 8

    key = jax.random.PRNGKey(0)
    k_x, k_p = jax.random.split(key)
    x = jax.random.normal(k_x, (batch, feature_size), jnp.float32)

    raw = make_params(k_p, feature_size, hidden_size, output_size)
    packed = pack_params(raw, feature_size, hidden_size, output_size)

    bf16_ew = _bf16_elementwise_default()
    out = lstm_forward(x, packed, out_features=output_size,
                       bf16_elementwise=bf16_ew)
    out = jax.block_until_ready(out)

    ref = reference_forward(x, raw, hidden_size)
    # bf16 MXU inputs -> looser tolerance than the old pure-f32 path.
    np.testing.assert_allclose(np.asarray(out), np.asarray(ref),
                               rtol=2e-2, atol=2e-2)
    assert out.shape == (batch, output_size)
    print("KERNEL_OK")
</pallas_src>

<mosaic_0001>
module attributes {stable_mosaic.version = 11 : i64} {
  func.func @_lstm_fc_kernel(%arg0: i32, %arg1: memref<16x16xbf16, #tpu.memory_space<vmem>>, %arg2: memref<144x384xbf16, #tpu.memory_space<vmem>>, %arg3: memref<2x384xf32, #tpu.memory_space<vmem>>, %arg4: memref<128x128xbf16, #tpu.memory_space<vmem>>, %arg5: memref<1x128xf32, #tpu.memory_space<vmem>>, %arg6: memref<16x128xf32, #tpu.memory_space<vmem>>) attributes {dimension_semantics = [#tpu.dimension_semantics<parallel>], iteration_bounds = array<i64: 1>, scalar_prefetch = 0 : i64, scratch_operands = 0 : i64, tpu.core_type = #tpu.core_type<tc>, window_params = [{transform_indices = @transform_0, window_bounds = array<i64: 16, 16>}, {pipeline_mode = #tpu.pipeline_mode<synchronous>, transform_indices = @transform_1, window_bounds = array<i64: 144, 384>}, {pipeline_mode = #tpu.pipeline_mode<synchronous>, transform_indices = @transform_2, window_bounds = array<i64: 2, 384>}, {pipeline_mode = #tpu.pipeline_mode<synchronous>, transform_indices = @transform_3, window_bounds = array<i64: 128, 128>}, {pipeline_mode = #tpu.pipeline_mode<synchronous>, transform_indices = @transform_4, window_bounds = array<i64: 1, 128>}, {transform_indices = @transform_5, window_bounds = array<i64: 16, 128>}]} {
    %c0 = arith.constant 0 : index
    %c0_0 = arith.constant 0 : index
    %0 = vector.load %arg1[%c0, %c0_0] : memref<16x16xbf16, #tpu.memory_space<vmem>>, vector<16x16xbf16>
    %c0_1 = arith.constant 0 : index
    %c0_2 = arith.constant 0 : index
    %1 = vector.load %arg2[%c0_1, %c0_2] : memref<144x384xbf16, #tpu.memory_space<vmem>>, vector<16x384xbf16>
    %c0_3 = arith.constant 0 : index
    %c0_4 = arith.constant 0 : index
    %2 = vector.load %arg3[%c0_3, %c0_4] : memref<2x384xf32, #tpu.memory_space<vmem>>, vector<1x384xf32>
    %cst = arith.constant dense<0.000000e+00> : vector<16x384xf32>
    %3 = tpu.matmul %0, %1, %cst {dimension_numbers = #tpu.dot_dimension_numbers<[1], [0], [0], [1], [0, 0, 1, 1], [], []>} : vector<16x16xbf16>, vector<16x384xbf16>, vector<16x384xf32> -> vector<16x384xf32>
    %4 = vector.broadcast %2 : vector<1x384xf32> to vector<16x384xf32>
    %5 = arith.addf %3, %4 : vector<16x384xf32>
    %6 = arith.truncf %5 : vector<16x384xf32> to vector<16x384xbf16>
    %7 = vector.extract_strided_slice %6 {offsets = [0, 0], sizes = [16, 128], strides = [1, 1]} : vector<16x384xbf16> to vector<16x128xbf16>
    %cst_5 = arith.constant 5.000000e-01 : bf16
    %8 = vector.broadcast %cst_5 : bf16 to vector<16x128xbf16>
    %9 = arith.mulf %8, %7 : vector<16x128xbf16>
    %10 = math.tanh %9 : vector<16x128xbf16>
    %cst_6 = arith.constant 5.000000e-01 : bf16
    %11 = vector.broadcast %cst_6 : bf16 to vector<16x128xbf16>
    %12 = arith.mulf %11, %10 : vector<16x128xbf16>
    %cst_7 = arith.constant 5.000000e-01 : bf16
    %13 = vector.broadcast %cst_7 : bf16 to vector<16x128xbf16>
    %14 = arith.addf %12, %13 : vector<16x128xbf16>
    %15 = vector.extract_strided_slice %6 {offsets = [0, 128], sizes = [16, 128], strides = [1, 1]} : vector<16x384xbf16> to vector<16x128xbf16>
    %16 = math.tanh %15 : vector<16x128xbf16>
    %17 = vector.extract_strided_slice %6 {offsets = [0, 256], sizes = [16, 128], strides = [1, 1]} : vector<16x384xbf16> to vector<16x128xbf16>
    %cst_8 = arith.constant 5.000000e-01 : bf16
    %18 = vector.broadcast %cst_8 : bf16 to vector<16x128xbf16>
    %19 = arith.mulf %18, %17 : vector<16x128xbf16>
    %20 = math.tanh %19 : vector<16x128xbf16>
    %cst_9 = arith.constant 5.000000e-01 : bf16
    %21 = vector.broadcast %cst_9 : bf16 to vector<16x128xbf16>
    %22 = arith.mulf %21, %20 : vector<16x128xbf16>
    %cst_10 = arith.constant 5.000000e-01 : bf16
    %23 = vector.broadcast %cst_10 : bf16 to vector<16x128xbf16>
    %24 = arith.addf %22, %23 : vector<16x128xbf16>
    %25 = arith.mulf %14, %16 : vector<16x128xbf16>
    %26 = math.tanh %25 : vector<16x128xbf16>
    %27 = arith.mulf %24, %26 : vector<16x128xbf16>
    %c16 = arith.constant 16 : index
    %c0_11 = arith.constant 0 : index
    %28 = vector.load %arg2[%c16, %c0_11] : memref<144x384xbf16, #tpu.memory_space<vmem>>, vector<128x384xbf16>
    %c1 = arith.constant 1 : index
    %c0_12 = arith.constant 0 : index
    %29 = vector.load %arg3[%c1, %c0_12] : memref<2x384xf32, #tpu.memory_space<vmem>>, vector<1x384xf32>
    %cst_13 = arith.constant dense<0.000000e+00> : vector<16x384xf32>
    %30 = tpu.matmul %27, %28, %cst_13 {dimension_numbers = #tpu.dot_dimension_numbers<[1], [0], [0], [1], [0, 0, 1, 1], [], []>} : vector<16x128xbf16>, vector<128x384xbf16>, vector<16x384xf32> -> vector<16x384xf32>
    %31 = vector.broadcast %29 : vector<1x384xf32> to vector<16x384xf32>
    %32 = arith.addf %30, %31 : vector<16x384xf32>
    %33 = arith.truncf %32 : vector<16x384xf32> to vector<16x384xbf16>
    %34 = vector.extract_strided_slice %33 {offsets = [0, 0], sizes = [16, 128], strides = [1, 1]} : vector<16x384xbf16> to vector<16x128xbf16>
    %cst_14 = arith.constant 5.000000e-01 : bf16
    %35 = vector.broadcast %cst_14 : bf16 to vector<16x128xbf16>
    %36 = arith.mulf %35, %34 : vector<16x128xbf16>
    %37 = math.tanh %36 : vector<16x128xbf16>
    %cst_15 = arith.constant 5.000000e-01 : bf16
    %38 = vector.broadcast %cst_15 : bf16 to vector<16x128xbf16>
    %39 = arith.mulf %38, %37 : vector<16x128xbf16>
    %cst_16 = arith.constant 5.000000e-01 : bf16
    %40 = vector.broadcast %cst_16 : bf16 to vector<16x128xbf16>
    %41 = arith.addf %39, %40 : vector<16x128xbf16>
    %42 = vector.extract_strided_slice %33 {offsets = [0, 128], sizes = [16, 128], strides = [1, 1]} : vector<16x384xbf16> to vector<16x128xbf16>
    %43 = math.tanh %42 : vector<16x128xbf16>
    %44 = vector.extract_strided_slice %33 {offsets = [0, 256], sizes = [16, 128], strides = [1, 1]} : vector<16x384xbf16> to vector<16x128xbf16>
    %cst_17 = arith.constant 5.000000e-01 : bf16
    %45 = vector.broadcast %cst_17 : bf16 to vector<16x128xbf16>
    %46 = arith.mulf %45, %44 : vector<16x128xbf16>
    %47 = math.tanh %46 : vector<16x128xbf16>
    %cst_18 = arith.constant 5.000000e-01 : bf16
    %48 = vector.broadcast %cst_18 : bf16 to vector<16x128xbf16>
    %49 = arith.mulf %48, %47 : vector<16x128xbf16>
    %cst_19 = arith.constant 5.000000e-01 : bf16
    %50 = vector.broadcast %cst_19 : bf16 to vector<16x128xbf16>
    %51 = arith.addf %49, %50 : vector<16x128xbf16>
    %52 = arith.mulf %41, %43 : vector<16x128xbf16>
    %53 = math.tanh %52 : vector<16x128xbf16>
    %54 = arith.mulf %51, %53 : vector<16x128xbf16>
    %c0_20 = arith.constant 0 : index
    %c0_21 = arith.constant 0 : index
    %55 = vector.load %arg4[%c0_20, %c0_21] : memref<128x128xbf16, #tpu.memory_space<vmem>>, vector<128x128xbf16>
    %cst_22 = arith.constant dense<0.000000e+00> : vector<16x128xf32>
    %56 = tpu.matmul %54, %55, %cst_22 {dimension_numbers = #tpu.dot_dimension_numbers<[1], [0], [0], [1], [0, 0, 1, 1], [], []>} : vector<16x128xbf16>, vector<128x128xbf16>, vector<16x128xf32> -> vector<16x128xf32>
    %c0_23 = arith.constant 0 : index
    %c0_24 = arith.constant 0 : index
    %57 = vector.load %arg5[%c0_23, %c0_24] : memref<1x128xf32, #tpu.memory_space<vmem>>, vector<1x128xf32>
    %58 = vector.broadcast %57 : vector<1x128xf32> to vector<16x128xf32>
    %59 = arith.addf %56, %58 : vector<16x128xf32>
    %c0_25 = arith.constant 0 : index
    %c0_26 = arith.constant 0 : index
    %60 = vector.load %arg6[%c0_25, %c0_26] : memref<16x128xf32, #tpu.memory_space<vmem>>, vector<16x128xf32>
    tpu.vector_store %arg6[%c0_25, %c0_26], %59 {strides = array<i32>} : memref<16x128xf32, #tpu.memory_space<vmem>>, vector<16x128xf32>,
    return
  }
  func.func @transform_0(%arg0: i32) -> (i32, i32) {
    %c0_i32 = arith.constant 0 : i32
    %c0_i32_0 = arith.constant 0 : i32
    return %arg0, %c0_i32 : i32, i32
  }
  func.func @transform_1(%arg0: i32) -> (i32, i32) {
    %c0_i32 = arith.constant 0 : i32
    %c0_i32_0 = arith.constant 0 : i32
    %c0_i32_1 = arith.constant 0 : i32
    return %c0_i32, %c0_i32_0 : i32, i32
  }
  func.func @transform_2(%arg0: i32) -> (i32, i32) {
    %c0_i32 = arith.constant 0 : i32
    %c0_i32_0 = arith.constant 0 : i32
    %c0_i32_1 = arith.constant 0 : i32
    return %c0_i32, %c0_i32_0 : i32, i32
  }
  func.func @transform_3(%arg0: i32) -> (i32, i32) {
    %c0_i32 = arith.constant 0 : i32
    %c0_i32_0 = arith.constant 0 : i32
    %c0_i32_1 = arith.constant 0 : i32
    return %c0_i32, %c0_i32_0 : i32, i32
  }
  func.func @transform_4(%arg0: i32) -> (i32, i32) {
    %c0_i32 = arith.constant 0 : i32
    %c0_i32_0 = arith.constant 0 : i32
    %c0_i32_1 = arith.constant 0 : i32
    return %c0_i32, %c0_i32_0 : i32, i32
  }
  func.func @transform_5(%arg0: i32) -> (i32, i32) {
    %c0_i32 = arith.constant 0 : i32
    %c0_i32_0 = arith.constant 0 : i32
    return %arg0, %c0_i32 : i32, i32
  }
}

</mosaic_0001>

<bundles_post_ra>
// kernel: lstm_forward_padded.1
= control target key start
LH: loop header
LB: loop body
LE: loop exit
PB: predicated region body
PF: predicated region fallthrough
CT: control target
= control target key end

     0   :  { %10 = vsyncpa [#allocation3], 0  ;;  %s1023_s0 = inlined_call_operand.hbm [shape: bf16[16,16], index: 0, kind: input, shape index: {}]   ;;  %s1024_s1 = inlined_call_operand.hbm [shape: bf16[144,384], index: 1, kind: input, shape index: {}]   ;;  %s1025_s2 = inlined_call_operand.hbm [shape: f32[2,384], index: 2, kind: input, shape index: {}]   ;;  %s1026_s3 = inlined_call_operand.hbm [shape: bf16[128,128], index: 3, kind: input, shape index: {}]   ;;  %s1027_s4 = inlined_call_operand.vmem [shape: f32[1,128], index: 4, kind: input, shape index: {}]   ;;  %s1028_s5 = inlined_call_operand.hbm [shape: f32[16,128], index: 5, kind: output, shape index: {}]  }
   0x1   :  { %11 = vsyncpa [#allocation6], 0 }
   0x2   :  { %12 = vsyncpa [#allocation9], 0 }
   0x3   :  { %13 = vsyncpa [#allocation4], 0  ;;  %s921_s18 = smov [#allocation5]  }
   0x4   :  { %s31_s19 = sshll.u32 %s921_s18, 4  ;;  %s32_s19 = int_to_ptr.vmem [resolvable:$true] %s31_s19 }
   0x5   :  { %s821_s20 = scalar_lea.vmem %s32_s19, 3456  ;;  %p826_p1 = scmp.lt.s32.totalorder %s32_s19, %s32_s19 }
   0x6   :  { %p822_p0 = scmp.ne.s32.totalorder %s32_s19, %s821_s20  ;;  %p827_p2 = scmp.lt.s32.totalorder %s821_s20, %s821_s20 }
   0x8   :  { %p828_p3 = por %p827_p2, %p826_p1 }
   0xa   :  { %p829_p4 = pnand %p828_p3, %p822_p0 }
   0xc   :  { %832 = shalt.err (!%p829_p4)
}
   0xd   :  { %s922_s21 = smov 192   ;;  %s923_s22 = smov 12  }
   0xe   :  { %37 = dma.hbm_to_vmem [thread:$0]  %s1024_s1, 3456, %s32_s19, [#allocation6], %s922_s21, %s922_s21, %s923_s22  }
   0xf   :  { %s924_s25 = smov [#allocation2]  }
  0x10   :  { %s19_s26 = sshll.u32 %s924_s25, 4  ;;  %s20_s26 = int_to_ptr.vmem [resolvable:$true] %s19_s26 }
  0x11   :  { %s841_s27 = scalar_lea.vmem %s20_s26, 128  ;;  %p846_p6 = scmp.lt.s32.totalorder %s20_s26, %s20_s26 }
  0x12   :  { %p842_p5 = scmp.ne.s32.totalorder %s20_s26, %s841_s27  ;;  %p847_p7 = scmp.lt.s32.totalorder %s841_s27, %s841_s27 }
  0x14   :  { %p848_p8 = por %p847_p7, %p846_p6 }
  0x16   :  { %p849_p9 = pnand %p848_p8, %p842_p5 }
  0x18   :  { %852 = shalt.err (!%p849_p9)
}
  0x19   :  { %s925_s28 = smov 64   ;;  %s926_s29 = smov 4  }
  0x1a   :  { %25 = dma.hbm_to_vmem [thread:$0]  %s1023_s0, 128, %s20_s26, [#allocation3], %s925_s28, %s925_s28, %s926_s29  }
  0x1b   :  { %s927_s7 = smov [#allocation7]   ;;  %s928_s9 = smov [#allocation8]  }
  0x1c   :  { %s44_s8 = sshll.u32 %s927_s7, 4  ;;  %s53_s1 = sshll.u32 %s928_s9, 4  ;;  %s45_s8 = int_to_ptr.vmem [resolvable:$true] %s44_s8  ;;  %s54_s1 = int_to_ptr.vmem [resolvable:$true] %s53_s1 }
  0x1d   :  { %s861_s10 = scalar_lea.vmem %s45_s8, 96  ;;  %p866_p11 = scmp.lt.s32.totalorder %s45_s8, %s45_s8 }
  0x1e   :  { %p862_p10 = scmp.ne.s32.totalorder %s45_s8, %s861_s10  ;;  %p867_p12 = scmp.lt.s32.totalorder %s861_s10, %s861_s10 }
  0x20   :  { %p868_p13 = por %p867_p12, %p866_p11 }
  0x22   :  { %p869_p0 = pnand %p868_p13, %p862_p10 }
  0x24   :  { %872 = shalt.err (!%p869_p0)
}
  0x25   :  { %47 = dma.hbm_to_vmem [thread:$0]  %s1025_s2, 96, %s45_s8, [#allocation6]  }
  0x26   :  { %s881_s13 = scalar_lea.vmem %s54_s1, 1024  ;;  %p886_p2 = scmp.lt.s32.totalorder %s54_s1, %s54_s1 }
  0x27   :  { %p882_p1 = scmp.ne.s32.totalorder %s54_s1, %s881_s13  ;;  %p887_p3 = scmp.lt.s32.totalorder %s881_s13, %s881_s13 }
  0x29   :  { %p888_p4 = por %p887_p3, %p886_p2 }
  0x2b   :  { %p889_p5 = pnand %p888_p4, %p882_p1 }
  0x2d   :  { %892 = shalt.err (!%p889_p5)
}
  0x2e   :  { %59 = dma.hbm_to_vmem [thread:$0]  %s1026_s3, 1024, %s54_s1, [#allocation9], %s925_s28, %s925_s28, %s926_s29  }
  0x2f   :  { %913 = dma.done.wait [#allocation3], 128  }
  0x30   :  { %914 = vsyncadd [#allocation3], 4294967168 }
  0x31   :  { %915 = dma.done.wait [#allocation6], 3552  }
  0x32   :  { %916 = vsyncadd [#allocation6], 4294963744 }
  0x33   :  { %917 = dma.done.wait [#allocation9], 1024  }
  0x34   :  { %918 = vsyncadd [#allocation9], 4294966272  ;;  %v929_v0 = vmov 0   ;;  %v752_v1 = vld [vmem:[#allocation5 + $0x4] ss:$12 sps:$4 sm:$0xff]   ;;  %v755_v3 = vld [vmem:[#allocation2] sm:$0xff]   ;;  %v84_v30 = vlaneseq }
  0x35   :  { %156 = vmatprep.mubr.bf16.mxu1 %v929_v0  ;;  %433 = vmatprep.mubr.bf16.mxu0 %v929_v0  ;;  %v754_v2 = vld [vmem:[#allocation5] ss:$12 sps:$4 sm:$0xff]   ;;  %vm120_vm0 = vcmask 130048   ;;  %v756_v4 = vld [vmem:[#allocation5 + $0x8] ss:$12 sps:$4 sm:$0xff]   ;;  %v930_v5 = vmov 0.0  }
  0x36   :  { %138 = vmatprep.subr.bf16.mxu1 %v752_v1  ;;  %vm931_vm1 = vmmov 0   ;;  %v757_v6 = vld [vmem:[#allocation5 + $0xc4] ss:$12 sps:$4 sm:$0xff]   ;;  %v759_v7 = vld [vmem:[#allocation5 + $0xc0] ss:$12 sps:$4 sm:$0xff]   ;;  %v991_v31 = vshrl.u32 %v84_v30, 7 }
  0x37   :  { %139 = vmatpush1.bf16.msra.mxu1 %v754_v2  ;;  %v760_v8 = vld [vmem:[#allocation5 + $0xc8] ss:$12 sps:$4 sm:$0xff]   ;;  %401 = vmatprep.subr.bf16.mxu0 %v757_v6  ;;  %v761_v9 = vld [vmem:[#allocation5 + $0xac] ss:$12 sps:$4 sm:$0xff]   ;;  %v764_v11 = vld [vmem:[#allocation5 + $0xb0] ss:$12 sps:$4 sm:$0xff]  }
  0x38   :  { %692 = vmatprep.subr.bf16.mxu1 %v930_v5  ;;  %402 = vmatpush1.bf16.msra.mxu0 %v759_v7  ;;  %v763_v10 = vld [vmem:[#allocation5 + $0xa8] ss:$12 sps:$4 sm:$0xff]   ;;  %v767_v13 = vld [vmem:[#allocation5 + $0x90] ss:$12 sps:$4 sm:$0xff]   ;;  %v768_v14 = vld [vmem:[#allocation5 + $0x98] ss:$12 sps:$4 sm:$0xff]  }
  0x39   :  { %403 = vmatprep.subr.bf16.mxu0 %v761_v9  ;;  %v765_v12 = vld [vmem:[#allocation5 + $0x94] ss:$12 sps:$4 sm:$0xff]   ;;  %v769_v15 = vld [vmem:[#allocation5 + $0x7c] ss:$12 sps:$4 sm:$0xff]   ;;  %v771_v16 = vld [vmem:[#allocation5 + $0x78] ss:$12 sps:$4 sm:$0xff]  }
  0x3a   :  { %637 = vmatmul.mubr.msk.bf16.vlgmr.msra.gmra.mxu1 %vm120_vm0, %v755_v3  ;;  %v772_v17 = vld [vmem:[#allocation5 + $0x80] ss:$12 sps:$4 sm:$0xff]   ;;  %v773_v18 = vld [vmem:[#allocation5 + $0x64] ss:$12 sps:$4 sm:$0xff]   ;;  %v776_v20 = vld [vmem:[#allocation5 + $0x68] ss:$12 sps:$4 sm:$0xff]  }
  0x3b   :  { %693 = vmatpush3.bf16.msra.mxu1 %v756_v4  ;;  %694 = vmatprep.mubr.msk.bf16.mxu1 %vm931_vm1, %v930_v5  ;;  %v775_v19 = vld [vmem:[#allocation5 + $0x60] ss:$12 sps:$4 sm:$0xff]   ;;  %v779_v22 = vld [vmem:[#allocation5 + $0x48] ss:$12 sps:$4 sm:$0xff]   ;;  %v780_v23 = vld [vmem:[#allocation5 + $0x50] ss:$12 sps:$4 sm:$0xff]  }
  0x3c   :  { %698 = vmatprep.subr.bf16.mxu1 %v930_v5  ;;  %404 = vmatpush1.bf16.msra.mxu0 %v763_v10  ;;  %v777_v21 = vld [vmem:[#allocation5 + $0x4c] ss:$12 sps:$4 sm:$0xff]   ;;  %v781_v24 = vld [vmem:[#allocation5 + $0x34] ss:$12 sps:$4 sm:$0xff]   ;;  %v783_v25 = vld [vmem:[#allocation5 + $0x30] ss:$12 sps:$4 sm:$0xff]  }
  0x3d   :  { %405 = vmatprep.subr.bf16.mxu0 %v765_v12  ;;  %v784_v26 = vld [vmem:[#allocation5 + $0x38] ss:$12 sps:$4 sm:$0xff]   ;;  %v785_v27 = vld [vmem:[#allocation5 + $0x1c] ss:$12 sps:$4 sm:$0xff]   ;;  %v788_v29 = vld [vmem:[#allocation5 + $0x20] ss:$12 sps:$4 sm:$0xff]  }
  0x3e   :  { %v787_v28 = vld [vmem:[#allocation5 + $0x18] ss:$12 sps:$4 sm:$0xff]   ;;  %v86_v32 = vsub.s32 0, %v991_v31  ;;  %v90_v36 = vsub.s32 1, %v991_v31  ;;  %v94_v39 = vsub.s32 2, %v991_v31  ;;  %v790_v6 = vld [vmem:[#allocation8 + $0x30] sm:$0xff]  }
  0x3f   :  { %v82_v33 = vld [vmem:[#allocation7] ss:$2 sm:$0x7]  ;;  %v791_v7 = vld [vmem:[#allocation8 + $0x28] sm:$0xff]   ;;  %v794_v10 = vld [vmem:[#allocation8 + $0x10] sm:$0xff]   ;;  %s932_s15 = smov [#allocation10]  }
  0x40   :  { %406 = vmatpush1.bf16.msra.mxu0 %v767_v13  ;;  %v87_v35 = vrot.slane %v82_v33, %v86_v32  ;;  %v91_v41 = vrot.slane %v82_v33, %v90_v36  ;;  %v95_v46 = vrot.slane %v82_v33, %v94_v39  ;;  %v789_v4 = vld [vmem:[#allocation8 + $0x38] sm:$0xff]   ;;  %v796_v12 = vld [vmem:[#allocation8] sm:$0xff]   ;;  %s619_s16 = sshll.u32 %s932_s15, 4  ;;  %s620_s16 = int_to_ptr.vmem [resolvable:$true] %s619_s16 }
  0x41   :  { %407 = vmatprep.subr.bf16.mxu0 %v769_v15  ;;  %v793_v9 = vld [vmem:[#allocation8 + $0x18] sm:$0xff]   ;;  %s893_s17 = scalar_lea.vmem %s620_s16, 256  ;;  %p898_p7 = scmp.lt.s32.totalorder %s620_s16, %s620_s16 }
  0x42   :  { %695 = vmatmul.mubr.msk.bf16.vlgmr.msra.gmra.mxu1 %vm120_vm0, %v755_v3  ;;  %v256_v13 = vld [vmem:[#allocation7 + $0x1] ss:$2 sm:$0x7]  ;;  %p894_p6 = scmp.ne.s32.totalorder %s620_s16, %s893_s17  ;;  %p899_p8 = scmp.lt.s32.totalorder %s893_s17, %s893_s17 }
  0x43   :  { %714 = vmatprep.mubr.msk.bf16.mxu1 %vm931_vm1, %v930_v5  ;;  %699 = vmatpush3.bf16.msra.mxu1 %v760_v8  ;;  %v792_v8 = vld [vmem:[#allocation8 + $0x20] sm:$0xff]  }
  0x44   :  { %700 = vmatprep.subr.bf16.mxu1 %v930_v5  ;;  %408 = vmatpush1.bf16.msra.mxu0 %v771_v16  ;;  %v261_v16 = vrot.slane %v256_v13, %v86_v32  ;;  %p900_p9 = por %p899_p8, %p898_p7 }
  0x45   :  { %409 = vmatprep.subr.bf16.mxu0 %v773_v18 }
  0x46   :  { %p901_p10 = pnand %p900_p9, %p894_p6 }
  0x47   :  { %701 = vmatpush3.bf16.msra.mxu1 %v764_v11  ;;  %v795_v11 = vld [vmem:[#allocation8 + $0x8] sm:$0xff]  }
  0x48   :  { %702 = vmatprep.subr.bf16.mxu1 %v930_v5  ;;  %410 = vmatpush1.bf16.msra.mxu0 %v775_v19 }
  0x49   :  { %411 = vmatprep.subr.bf16.mxu0 %v777_v21 }
  0x4b   :  { %703 = vmatpush3.bf16.msra.mxu1 %v768_v14 }
  0x4c   :  { %704 = vmatprep.subr.bf16.mxu1 %v930_v5  ;;  %412 = vmatpush1.bf16.msra.mxu0 %v779_v22  ;;  %v265_v22 = vrot.slane %v256_v13, %v90_v36 }
  0x4d   :  { %413 = vmatprep.subr.bf16.mxu0 %v781_v24 }
  0x4f   :  { %705 = vmatpush3.bf16.msra.mxu1 %v772_v17 }
  0x50   :  { %706 = vmatprep.subr.bf16.mxu1 %v930_v5  ;;  %414 = vmatpush1.bf16.msra.mxu0 %v783_v25 }
  0x51   :  { %415 = vmatprep.subr.bf16.mxu0 %v785_v27 }
  0x53   :  { %707 = vmatpush3.bf16.msra.mxu1 %v776_v20 }
  0x54   :  { %708 = vmatprep.subr.bf16.mxu1 %v930_v5  ;;  %416 = vmatpush1.bf16.msra.mxu0 %v787_v28 }
  0x55   :  { %718 = vmatprep.subr.bf16.mxu0 %v930_v5 }
  0x57   :  { %709 = vmatpush3.bf16.msra.mxu1 %v780_v23 }
  0x58   :  { %710 = vmatprep.subr.bf16.mxu1 %v930_v5 }
  0x5b   :  { %711 = vmatpush3.bf16.msra.mxu1 %v784_v26 }
  0x5c   :  { %712 = vmatprep.subr.bf16.mxu1 %v930_v5 }
  0x5f   :  { %713 = vmatpush3.bf16.msra.mxu1 %v788_v29  ;;  %v269_v29 = vrot.slane %v256_v13, %v94_v39  ;;  %v663_v39 = vld [vmem:[%s1027_s4] ss:$0 sm:$0xff] }
  0xfa   :  { %v158_v34 = vpop.f32.mrf.mxu1 }
  0xfb   :  { %v159_v40 = vadd.f32 %v158_v34, %v87_v35 }
  0xfc   :  { %v160_v37 = vpop.f32.mrf.mxu1 }
  0xfd   :  { %v161_v48 = vadd.f32 %v160_v37, %v91_v41 }
  0xfe   :  { %v162_v38 = vpop.f32.mrf.mxu1 }
  0xff   :  { %v163_v42 = vadd.f32 %v162_v38, %v87_v35 }
 0x100   :  { %v164_v43 = vpop.f32.mrf.mxu1 }
 0x101   :  { %v208_v44 = vpack.c.bf16 %v163_v42, %v159_v40  ;;  %v165_v45 = vadd.f32 %v164_v43, %v91_v41 }
 0x102   :  { %v201_v47 = vpop.f32.mrf.mxu1 }
 0x103   :  { %v211_v49 = vmul.bf16 1056980736, %v208_v44  ;;  %v209_v51 = vpack.c.bf16 %v165_v45, %v161_v48  ;;  %v202_v52 = vadd.f32 %v201_v47, %v95_v46 }
 0x104   :  { %v696_v50 = vpop.f32.mrf.mxu1 }
 0x105   :  { %797 = vtanh.bf16 %v211_v49 }
 0x106   :  { %v204_v53 = vpop.f32.mrf.mxu1  ;;  %799 = vtanh.bf16 %v209_v51 }
 0x107   :  { %v205_v54 = vadd.f32 %v204_v53, %v95_v46 }
 0x108   :  { %v697_v55 = vpop.f32.mrf.mxu1 }
 0x109   :  { %v210_v56 = vpack.c.bf16 %v205_v54, %v202_v52 }
 0x10b   :  { %v216_v57 = vmul.bf16 1056980736, %v210_v56 }
 0x10d   :  { %801 = vtanh.bf16 %v216_v57 }
 0x113   :  { %v798_v58 = vpop.eup %797 }
 0x114   :  { %v213_v59 = vmul.bf16 1056980736, %v798_v58  ;;  %v800_v61 = vpop.eup %799 }
 0x116   :  { %v214_v60 = vadd.bf16 1056980736, %v213_v59 }
 0x118   :  { %v220_v62 = vmul.bf16 %v800_v61, %v214_v60 }
 0x11a   :  { %803 = vtanh.bf16 %v220_v62 }
 0x11b   :  { %v802_v63 = vpop.eup %801 }
 0x11c   :  { %v218_v0 = vmul.bf16 1056980736, %v802_v63 }
 0x11e   :  { %v219_v1 = vadd.bf16 1056980736, %v218_v0 }
 0x128   :  { %v804_v2 = vpop.eup %803 }
 0x129   :  { %v222_v3 = vmul.bf16 %v804_v2, %v219_v1 }
 0x12b   :  { %434 = vmatmul.mubr.bf16.vlgmr.msra.gmra.mxu0 %v222_v3  ;;  %715 = vmatmul.mubr.bf16.vlgmr.msra.gmra.mxu1 %v222_v3 }
 0x12c   :  { %734 = vmatprep.mubr.msk.bf16.mxu0 %vm931_vm1, %v930_v5  ;;  %719 = vmatpush3.bf16.msra.mxu0 %v789_v4 }
 0x12d   :  { %720 = vmatprep.subr.bf16.mxu0 %v930_v5 }
 0x130   :  { %721 = vmatpush3.bf16.msra.mxu0 %v790_v6 }
 0x131   :  { %722 = vmatprep.subr.bf16.mxu0 %v930_v5 }
 0x134   :  { %723 = vmatpush3.bf16.msra.mxu0 %v791_v7 }
 0x135   :  { %724 = vmatprep.subr.bf16.mxu0 %v930_v5 }
 0x138   :  { %725 = vmatpush3.bf16.msra.mxu0 %v792_v8 }
 0x139   :  { %726 = vmatprep.subr.bf16.mxu0 %v930_v5 }
 0x13c   :  { %727 = vmatpush3.bf16.msra.mxu0 %v793_v9 }
 0x13d   :  { %728 = vmatprep.subr.bf16.mxu0 %v930_v5 }
 0x140   :  { %729 = vmatpush3.bf16.msra.mxu0 %v794_v10 }
 0x141   :  { %730 = vmatprep.subr.bf16.mxu0 %v930_v5 }
 0x144   :  { %731 = vmatpush3.bf16.msra.mxu0 %v795_v11 }
 0x145   :  { %732 = vmatprep.subr.bf16.mxu0 %v930_v5 }
 0x148   :  { %733 = vmatpush3.bf16.msra.mxu0 %v796_v12 }
 0x1eb   :  { %v435_v14 = vpop.f32.mrf.mxu0  ;;  %v478_v15 = vpop.f32.mrf.mxu1 }
 0x1ec   :  { %v436_v21 = vadd.f32 %v435_v14, %v261_v16  ;;  %v479_v33 = vadd.f32 %v478_v15, %v269_v29 }
 0x1ed   :  { %v437_v17 = vpop.f32.mrf.mxu0  ;;  %v716_v18 = vpop.f32.mrf.mxu1 }
 0x1ee   :  { %v438_v27 = vadd.f32 %v437_v17, %v265_v22 }
 0x1ef   :  { %v439_v19 = vpop.f32.mrf.mxu0  ;;  %v481_v20 = vpop.f32.mrf.mxu1 }
 0x1f0   :  { %v440_v23 = vadd.f32 %v439_v19, %v261_v16  ;;  %v482_v32 = vadd.f32 %v481_v20, %v269_v29 }
 0x1f1   :  { %v441_v24 = vpop.f32.mrf.mxu0  ;;  %v717_v25 = vpop.f32.mrf.mxu1 }
 0x1f2   :  { %v485_v26 = vpack.c.bf16 %v440_v23, %v436_v21  ;;  %v442_v5 = vadd.f32 %v441_v24, %v265_v22  ;;  %v487_v34 = vpack.c.bf16 %v482_v32, %v479_v33 }
 0x1f4   :  { %v488_v28 = vmul.bf16 1056980736, %v485_v26  ;;  %v486_v30 = vpack.c.bf16 %v442_v5, %v438_v27  ;;  %v493_v35 = vmul.bf16 1056980736, %v487_v34 }
 0x1f6   :  { %805 = vtanh.bf16 %v488_v28 }
 0x1f7   :  { %807 = vtanh.bf16 %v486_v30 }
 0x1f8   :  { %809 = vtanh.bf16 %v493_v35 }
 0x204   :  { %v806_v37 = vpop.eup %805 }
 0x205   :  { %v490_v36 = vmul.bf16 1056980736, %v806_v37  ;;  %v808_v40 = vpop.eup %807 }
 0x206   :  { %v810_v42 = vpop.eup %809 }
 0x207   :  { %v491_v38 = vadd.bf16 1056980736, %v490_v36  ;;  %v495_v43 = vmul.bf16 1056980736, %v810_v42 }
 0x209   :  { %v497_v41 = vmul.bf16 %v808_v40, %v491_v38  ;;  %v496_v44 = vadd.bf16 1056980736, %v495_v43 }
 0x20b   :  { %811 = vtanh.bf16 %v497_v41 }
 0x219   :  { %v812_v45 = vpop.eup %811 }
 0x21a   :  { %v499_v31 = vmul.bf16 %v812_v45, %v496_v44 }
 0x21c   :  { %735 = vmatmul.mubr.bf16.vlgmr.msra.gmra.mxu0 %v499_v31 }
 0x2dc   :  { %v605_v46 = vpop.f32.mrf.mxu0 }
 0x2dd   :  { %v606_v47 = vadd.f32 %v663_v39, %v605_v46 }
 0x2de   :  { %v736_v48 = vpop.f32.mrf.mxu0 }
 0x2df   :  { %612 = vst [vmem:[#allocation10] sm:$0xff] %v606_v47 }
 0x2e0   :  { %v608_v49 = vpop.f32.mrf.mxu0 }
 0x2e1   :  { %v609_v50 = vadd.f32 %v663_v39, %v608_v49 }
 0x2e2   :  { %v737_v51 = vpop.f32.mrf.mxu0 }
 0x2e3   :  { %613 = vst [vmem:[#allocation10 + $0x8] sm:$0xff] %v609_v50 }
 0x2e4   :  { %904 = shalt.err (!%p901_p10)
}
 0x2e5   :  { %s933_s18 = smov 128   ;;  %s934_s4 = smov 8  }
 0x2e6   :  { %625 = dma.vmem_to_hbm [thread:$0]  %s620_s16, 256, %s1028_s5, [#allocation4], %s933_s18, %s933_s18, %s934_s4  }
 0x2e7   :  { %919 = dma.done.wait [#allocation4], 256  }
 0x2e8   :  { %920 = vsyncadd [#allocation4], 4294967040 }
 0x2e9   :  { %629 = vsyncpa [#allocation3], 1 }
 0x2ea   :  { %630 = vsyncpa [#allocation6], 1 }
 0x2eb   :  { %631 = vsyncpa [#allocation9], 1 }
 0x2ec   :  { %632 = vsyncpa [#allocation4], 1 }

</bundles_post_ra>
